<compile_context>
chip_gen: v6e
topology: v6e:2x2x1
jax: 0.10.0
libtpu: 0.0.40
codegen_flags: <defaults>
</compile_context>

<pallas_src>
import functools
import math

import jax
import jax.numpy as jnp
from jax import lax
from jax.experimental import pallas as pl
from jax.experimental.pallas import tpu as pltpu


def _round_up(a, b):
    return -(-a // b) * b


# ----------------------------------------------------------------------------
# Fused conv kernel: one batch tile per grid step, K*K per-tap MXU matmuls.
# ----------------------------------------------------------------------------
def _conv_kernel(w_ref, off_ref, x_ref, out_ref, *, K, Wp, B_tile, L):
    """
    w_ref   : (K*K, Mp, Cp) bf16   per-tap kernel matrices (tap t = kj*K + ki)
    off_ref : (Mp, 1)       f32    per-kernel offset (resident block)
    x_ref   : (Cp, CHUNK)   bf16   batch-tile chunk: image b occupies lanes
                                   [b*L, b*L + Hp*Wp), zeros elsewhere.
    out_ref : (B_tile, Mp, L) f32  per-image output rows; junk columns beyond
                                   s*Wp (and the K-1 per-row junk columns) are
                                   cropped by the wrapper.
    """
    N = B_tile * L
    acc = None
    # K*K per-tap matmuls: for stride 1 the tap (kj, ki) operand is just the
    # contiguous lane-slice of the flattened padded chunk shifted by
    # kj*Wp + ki.  The MXU accumulates in f32; no im2col slab is ever built.
    for kj in range(K):
        for ki in range(K):
            t = kj * K + ki
            start = kj * Wp + ki
            xs = x_ref[:, start:start + N]                        # (Cp, N) bf16
            part = jnp.dot(w_ref[t], xs, preferred_element_type=jnp.float32)
            acc = part if acc is None else acc + part
    acc = acc + off_ref[...]                                      # f32, (Mp,1) bcast
    # Lane-aligned per-image stores (b*L is a multiple of 128 -> plain vst).
    for b in range(B_tile):
        out_ref[b] = acc[:, b * L:(b + 1) * L]


def fused_conv(xcat, wtaps, offset, *, K, Wp, B_tile, L, vmem_limit_bytes):
    """xcat: (nbt, Cp, CHUNK) bf16, wtaps: (K*K, Mp, Cp) bf16, offset: (Mp,1) f32."""
    nbt, Cp, CHUNK = xcat.shape
    KK, Mp, _ = wtaps.shape
    kern = functools.partial(_conv_kernel, K=K, Wp=Wp, B_tile=B_tile, L=L)
    return pl.pallas_call(
        kern,
        out_shape=jax.ShapeDtypeStruct((nbt, B_tile, Mp, L), jnp.float32),
        grid_spec=pltpu.PrefetchScalarGridSpec(
            num_scalar_prefetch=0,
            grid=(nbt,),
            in_specs=[
                pl.BlockSpec((KK, Mp, Cp), lambda i: (0, 0, 0)),     # weights (resident)
                pl.BlockSpec((Mp, 1), lambda i: (0, 0)),             # offset (resident)
                pl.BlockSpec((None, Cp, CHUNK), lambda i: (i, 0, 0)),  # one batch tile
            ],
            out_specs=pl.BlockSpec((None, B_tile, Mp, L), lambda i: (i, 0, 0, 0)),
        ),
        compiler_params=pltpu.CompilerParams(
            dimension_semantics=("parallel",),   # batch tiles shard across TCs on v7x
            vmem_limit_bytes=vmem_limit_bytes,
        ),
    )(wtaps, offset, xcat)


# ----------------------------------------------------------------------------
# Module wrapper (mirrors the PyTorch ConvLayer forward pass).
# ----------------------------------------------------------------------------
class ConvLayerPallas:
    def __init__(self, input_channels, num_kernels, kernel_size, stride, padding, key):
        self.stride = stride
        self.padding = padding
        kw, ko = jax.random.split(key)
        # kaiming_uniform_(a=sqrt(5)) => bound = 1/sqrt(fan_in)
        fan_in_w = input_channels * kernel_size * kernel_size
        bound_w = 1.0 / math.sqrt(fan_in_w)
        self.weight = jax.random.uniform(
            kw, (num_kernels, input_channels, kernel_size, kernel_size),
            jnp.float32, -bound_w, bound_w)
        # offset has shape (num_kernels, 1, 1) => fan_in = 1 => bound = 1
        self.offset = jax.random.uniform(ko, (num_kernels, 1, 1), jnp.float32, -1.0, 1.0)

    def __call__(self, x):
        B, C, H, W = x.shape
        M, _, K, _ = self.weight.shape
        p, st = self.padding, self.stride
        # TODO(synk): stride > 1 needs a strided (non-contiguous) tap slice; the
        # fused lane-slice trick below assumes stride == 1.
        assert st == 1, "fused Pallas ConvLayer currently supports stride == 1 only"

        Hp, Wp = H + 2 * p, W + 2 * p
        s = (Hp - K + 1) // st

        # Lane-dense per-image width and tap-shift tail (multiples of 128).
        L = _round_up(Hp * Wp, 128)
        tail = _round_up((K - 1) * Wp + (K - 1), 128) if K > 1 else 0
        Cp = _round_up(C, 8)          # aligned contraction dim (zero channels)
        Mp = _round_up(M, 8)          # aligned output-kernel dim (zero rows)

        # Batch tile: big enough to amortize per-grid-step overhead, small
        # enough to bound VMEM (v7x: 64 MiB/TC), while keeping >= min(4, B)
        # grid steps so both v7x TensorCores get multiple pipelined steps.
        max_lanes = 4096
        bt_from_vmem = max(1, max_lanes // L)
        bt_from_steps = -(-B // min(4, B))
        B_tile = max(1, min(B, bt_from_vmem, bt_from_steps))
        nbt = -(-B // B_tile)
        Bp = nbt * B_tile
        CHUNK = B_tile * L + tail

        # Build the lane-contiguous, zero-padded bf16 chunk layout.  This whole
        # chain (cast + pads + transpose + reshape) is one fused XLA copy pass;
        # the kernel then reads it exactly once.
        # TODO(synk): for very large images, fold the spatial padding into the
        # kernel (DMA raw rows into a zeroed VMEM image) to drop this pass.
        xb = x.astype(jnp.bfloat16)
        xpad = jnp.pad(xb, ((0, Bp - B), (0, Cp - C), (p, p), (p, p)))
        xflat = xpad.reshape(Bp, Cp, Hp * Wp)
        xflat = jnp.pad(xflat, ((0, 0), (0, 0), (0, L - Hp * Wp)))
        xflat = xflat.reshape(nbt, B_tile, Cp, L)
        xcat = jnp.swapaxes(xflat, 1, 2).reshape(nbt, Cp, B_tile * L)
        if tail:
            xcat = jnp.pad(xcat, ((0, 0), (0, 0), (0, tail)))       # (nbt, Cp, CHUNK)

        # Per-tap kernel matrices (K*K, Mp, Cp); zero padding along M and C so
        # the padded channels / kernels contribute exactly zero.
        wtaps = jnp.transpose(self.weight, (2, 3, 0, 1)).reshape(K * K, M, C)
        wtaps = jnp.pad(wtaps, ((0, 0), (0, Mp - M), (0, Cp - C))).astype(jnp.bfloat16)
        off = jnp.pad(self.offset.reshape(M, 1), ((0, Mp - M), (0, 0)))

        # Explicit VMEM budget: double-buffered image/output blocks + resident
        # weights + f32 accumulator headroom, capped below v7x's 64 MiB/TC.
        block_bytes = (2 * Cp * CHUNK * 2
                       + 2 * B_tile * Mp * L * 4
                       + 2 * Mp * B_tile * L * 4
                       + K * K * Mp * Cp * 2 + Mp * 4)
        vmem_limit = int(min(64 * 2 ** 20, max(32 * 2 ** 20, 2 * block_bytes)))
        # TODO(synk): if block_bytes ever approaches the v7x cap (huge images),
        # add a lane-tile grid axis over output rows instead of shrinking B_tile.

        out = fused_conv(xcat, wtaps, off, K=K, Wp=Wp, B_tile=B_tile, L=L,
                         vmem_limit_bytes=vmem_limit)

        # (nbt, B_tile, Mp, L) -> (Bp, Mp, L) is a free contiguous reshape; the
        # final crop of junk kernels / junk columns is one fused XLA gather.
        # TODO(synk): emit bf16 from the kernel if the downstream layer consumes
        # bf16 (halves the output writeback).
        out = out.reshape(Bp, Mp, L)[:B, :M, :s * Wp]
        return out.reshape(B, M, s, Wp)[:, :, :, :s]


# ----------------------------------------------------------------------------
if __name__ == "__main__":
    key = jax.random.PRNGKey(0)
    k_x, k_layer = jax.random.split(key)

    B, C, Wimg = 2, 4, 16
    num_kernels, kernel_size, stride, padding = 8, 3, 1, 1

    x = jax.random.normal(k_x, (B, C, Wimg, Wimg), jnp.float32)

    layer = ConvLayerPallas(C, num_kernels, kernel_size, stride, padding, k_layer)
    fwd = jax.jit(lambda xx: layer(xx))
    out = jax.block_until_ready(fwd(x))

    # Reference: exact f32 conv on the SAME bf16-quantized operands (the kernel
    # feeds bf16 to the MXU with f32 accumulation), plus the f32 offset.
    xq = x.astype(jnp.bfloat16).astype(jnp.float32)
    wq = layer.weight.astype(jnp.bfloat16).astype(jnp.float32)
    ref = lax.conv_general_dilated(
        xq, wq,
        window_strides=(stride, stride),
        padding=[(padding, padding), (padding, padding)],
        dimension_numbers=("NCHW", "OIHW", "NCHW"),
        precision=lax.Precision.HIGHEST,
    ) + layer.offset[None]

    assert out.shape == (B, num_kernels, Wimg, Wimg), out.shape
    err = float(jnp.max(jnp.abs(out - ref)))
    assert jnp.allclose(out, ref, atol=1e-3, rtol=1e-3), err

    print("KERNEL_OK")
</pallas_src>

<mosaic_0001>
module attributes {stable_mosaic.version = 11 : i64} {
  func.func @_conv_kernel(%arg0: i32, %arg1: memref<9x8x8xbf16, #tpu.memory_space<vmem>>, %arg2: memref<8x1xf32, #tpu.memory_space<vmem>>, %arg3: memref<1x8x512xbf16, #tpu.memory_space<vmem>>, %arg4: memref<1x1x8x384xf32, #tpu.memory_space<vmem>>) attributes {dimension_semantics = [#tpu.dimension_semantics<parallel>], iteration_bounds = array<i64: 2>, scalar_prefetch = 0 : i64, scratch_operands = 0 : i64, tpu.core_type = #tpu.core_type<tc>, window_params = [{pipeline_mode = #tpu.pipeline_mode<synchronous>, transform_indices = @transform_0, window_bounds = array<i64: 9, 8, 8>}, {pipeline_mode = #tpu.pipeline_mode<synchronous>, transform_indices = @transform_1, window_bounds = array<i64: 8, 1>}, {transform_indices = @transform_2, window_bounds = array<i64: 1, 8, 512>}, {transform_indices = @transform_3, window_bounds = array<i64: 1, 1, 8, 384>}]} {
    %c0 = arith.constant 0 : index
    %c0_0 = arith.constant 0 : index
    %c0_1 = arith.constant 0 : index
    %0 = vector.load %arg3[%c0, %c0_0, %c0_1] : memref<1x8x512xbf16, #tpu.memory_space<vmem>>, vector<1x8x384xbf16>
    %1 = vector.shape_cast %0 : vector<1x8x384xbf16> to vector<8x384xbf16>
    %c0_2 = arith.constant 0 : index
    %c0_3 = arith.constant 0 : index
    %c0_4 = arith.constant 0 : index
    %2 = vector.load %arg1[%c0_2, %c0_3, %c0_4] : memref<9x8x8xbf16, #tpu.memory_space<vmem>>, vector<1x8x8xbf16>
    %3 = vector.shape_cast %2 : vector<1x8x8xbf16> to vector<8x8xbf16>
    %cst = arith.constant dense<0.000000e+00> : vector<8x384xf32>
    %4 = tpu.matmul %3, %1, %cst {dimension_numbers = #tpu.dot_dimension_numbers<[1], [0], [0], [1], [0, 0, 1, 1], [], []>} : vector<8x8xbf16>, vector<8x384xbf16>, vector<8x384xf32> -> vector<8x384xf32>
    %c0_5 = arith.constant 0 : index
    %c0_6 = arith.constant 0 : index
    %c1 = arith.constant 1 : index
    %5 = vector.load %arg3[%c0_5, %c0_6, %c1] : memref<1x8x512xbf16, #tpu.memory_space<vmem>>, vector<1x8x384xbf16>
    %6 = vector.shape_cast %5 : vector<1x8x384xbf16> to vector<8x384xbf16>
    %c1_7 = arith.constant 1 : index
    %c0_8 = arith.constant 0 : index
    %c0_9 = arith.constant 0 : index
    %7 = vector.load %arg1[%c1_7, %c0_8, %c0_9] : memref<9x8x8xbf16, #tpu.memory_space<vmem>>, vector<1x8x8xbf16>
    %8 = vector.shape_cast %7 : vector<1x8x8xbf16> to vector<8x8xbf16>
    %cst_10 = arith.constant dense<0.000000e+00> : vector<8x384xf32>
    %9 = tpu.matmul %8, %6, %cst_10 {dimension_numbers = #tpu.dot_dimension_numbers<[1], [0], [0], [1], [0, 0, 1, 1], [], []>} : vector<8x8xbf16>, vector<8x384xbf16>, vector<8x384xf32> -> vector<8x384xf32>
    %10 = arith.addf %4, %9 : vector<8x384xf32>
    %c0_11 = arith.constant 0 : index
    %c0_12 = arith.constant 0 : index
    %c2 = arith.constant 2 : index
    %11 = vector.load %arg3[%c0_11, %c0_12, %c2] : memref<1x8x512xbf16, #tpu.memory_space<vmem>>, vector<1x8x384xbf16>
    %12 = vector.shape_cast %11 : vector<1x8x384xbf16> to vector<8x384xbf16>
    %c2_13 = arith.constant 2 : index
    %c0_14 = arith.constant 0 : index
    %c0_15 = arith.constant 0 : index
    %13 = vector.load %arg1[%c2_13, %c0_14, %c0_15] : memref<9x8x8xbf16, #tpu.memory_space<vmem>>, vector<1x8x8xbf16>
    %14 = vector.shape_cast %13 : vector<1x8x8xbf16> to vector<8x8xbf16>
    %cst_16 = arith.constant dense<0.000000e+00> : vector<8x384xf32>
    %15 = tpu.matmul %14, %12, %cst_16 {dimension_numbers = #tpu.dot_dimension_numbers<[1], [0], [0], [1], [0, 0, 1, 1], [], []>} : vector<8x8xbf16>, vector<8x384xbf16>, vector<8x384xf32> -> vector<8x384xf32>
    %16 = arith.addf %10, %15 : vector<8x384xf32>
    %c0_17 = arith.constant 0 : index
    %c0_18 = arith.constant 0 : index
    %c18 = arith.constant 18 : index
    %17 = vector.load %arg3[%c0_17, %c0_18, %c18] : memref<1x8x512xbf16, #tpu.memory_space<vmem>>, vector<1x8x384xbf16>
    %18 = vector.shape_cast %17 : vector<1x8x384xbf16> to vector<8x384xbf16>
    %c3 = arith.constant 3 : index
    %c0_19 = arith.constant 0 : index
    %c0_20 = arith.constant 0 : index
    %19 = vector.load %arg1[%c3, %c0_19, %c0_20] : memref<9x8x8xbf16, #tpu.memory_space<vmem>>, vector<1x8x8xbf16>
    %20 = vector.shape_cast %19 : vector<1x8x8xbf16> to vector<8x8xbf16>
    %cst_21 = arith.constant dense<0.000000e+00> : vector<8x384xf32>
    %21 = tpu.matmul %20, %18, %cst_21 {dimension_numbers = #tpu.dot_dimension_numbers<[1], [0], [0], [1], [0, 0, 1, 1], [], []>} : vector<8x8xbf16>, vector<8x384xbf16>, vector<8x384xf32> -> vector<8x384xf32>
    %22 = arith.addf %16, %21 : vector<8x384xf32>
    %c0_22 = arith.constant 0 : index
    %c0_23 = arith.constant 0 : index
    %c19 = arith.constant 19 : index
    %23 = vector.load %arg3[%c0_22, %c0_23, %c19] : memref<1x8x512xbf16, #tpu.memory_space<vmem>>, vector<1x8x384xbf16>
    %24 = vector.shape_cast %23 : vector<1x8x384xbf16> to vector<8x384xbf16>
    %c4 = arith.constant 4 : index
    %c0_24 = arith.constant 0 : index
    %c0_25 = arith.constant 0 : index
    %25 = vector.load %arg1[%c4, %c0_24, %c0_25] : memref<9x8x8xbf16, #tpu.memory_space<vmem>>, vector<1x8x8xbf16>
    %26 = vector.shape_cast %25 : vector<1x8x8xbf16> to vector<8x8xbf16>
    %cst_26 = arith.constant dense<0.000000e+00> : vector<8x384xf32>
    %27 = tpu.matmul %26, %24, %cst_26 {dimension_numbers = #tpu.dot_dimension_numbers<[1], [0], [0], [1], [0, 0, 1, 1], [], []>} : vector<8x8xbf16>, vector<8x384xbf16>, vector<8x384xf32> -> vector<8x384xf32>
    %28 = arith.addf %22, %27 : vector<8x384xf32>
    %c0_27 = arith.constant 0 : index
    %c0_28 = arith.constant 0 : index
    %c20 = arith.constant 20 : index
    %29 = vector.load %arg3[%c0_27, %c0_28, %c20] : memref<1x8x512xbf16, #tpu.memory_space<vmem>>, vector<1x8x384xbf16>
    %30 = vector.shape_cast %29 : vector<1x8x384xbf16> to vector<8x384xbf16>
    %c5 = arith.constant 5 : index
    %c0_29 = arith.constant 0 : index
    %c0_30 = arith.constant 0 : index
    %31 = vector.load %arg1[%c5, %c0_29, %c0_30] : memref<9x8x8xbf16, #tpu.memory_space<vmem>>, vector<1x8x8xbf16>
    %32 = vector.shape_cast %31 : vector<1x8x8xbf16> to vector<8x8xbf16>
    %cst_31 = arith.constant dense<0.000000e+00> : vector<8x384xf32>
    %33 = tpu.matmul %32, %30, %cst_31 {dimension_numbers = #tpu.dot_dimension_numbers<[1], [0], [0], [1], [0, 0, 1, 1], [], []>} : vector<8x8xbf16>, vector<8x384xbf16>, vector<8x384xf32> -> vector<8x384xf32>
    %34 = arith.addf %28, %33 : vector<8x384xf32>
    %c0_32 = arith.constant 0 : index
    %c0_33 = arith.constant 0 : index
    %c36 = arith.constant 36 : index
    %35 = vector.load %arg3[%c0_32, %c0_33, %c36] : memref<1x8x512xbf16, #tpu.memory_space<vmem>>, vector<1x8x384xbf16>
    %36 = vector.shape_cast %35 : vector<1x8x384xbf16> to vector<8x384xbf16>
    %c6 = arith.constant 6 : index
    %c0_34 = arith.constant 0 : index
    %c0_35 = arith.constant 0 : index
    %37 = vector.load %arg1[%c6, %c0_34, %c0_35] : memref<9x8x8xbf16, #tpu.memory_space<vmem>>, vector<1x8x8xbf16>
    %38 = vector.shape_cast %37 : vector<1x8x8xbf16> to vector<8x8xbf16>
    %cst_36 = arith.constant dense<0.000000e+00> : vector<8x384xf32>
    %39 = tpu.matmul %38, %36, %cst_36 {dimension_numbers = #tpu.dot_dimension_numbers<[1], [0], [0], [1], [0, 0, 1, 1], [], []>} : vector<8x8xbf16>, vector<8x384xbf16>, vector<8x384xf32> -> vector<8x384xf32>
    %40 = arith.addf %34, %39 : vector<8x384xf32>
    %c0_37 = arith.constant 0 : index
    %c0_38 = arith.constant 0 : index
    %c37 = arith.constant 37 : index
    %41 = vector.load %arg3[%c0_37, %c0_38, %c37] : memref<1x8x512xbf16, #tpu.memory_space<vmem>>, vector<1x8x384xbf16>
    %42 = vector.shape_cast %41 : vector<1x8x384xbf16> to vector<8x384xbf16>
    %c7 = arith.constant 7 : index
    %c0_39 = arith.constant 0 : index
    %c0_40 = arith.constant 0 : index
    %43 = vector.load %arg1[%c7, %c0_39, %c0_40] : memref<9x8x8xbf16, #tpu.memory_space<vmem>>, vector<1x8x8xbf16>
    %44 = vector.shape_cast %43 : vector<1x8x8xbf16> to vector<8x8xbf16>
    %cst_41 = arith.constant dense<0.000000e+00> : vector<8x384xf32>
    %45 = tpu.matmul %44, %42, %cst_41 {dimension_numbers = #tpu.dot_dimension_numbers<[1], [0], [0], [1], [0, 0, 1, 1], [], []>} : vector<8x8xbf16>, vector<8x384xbf16>, vector<8x384xf32> -> vector<8x384xf32>
    %46 = arith.addf %40, %45 : vector<8x384xf32>
    %c0_42 = arith.constant 0 : index
    %c0_43 = arith.constant 0 : index
    %c38 = arith.constant 38 : index
    %47 = vector.load %arg3[%c0_42, %c0_43, %c38] : memref<1x8x512xbf16, #tpu.memory_space<vmem>>, vector<1x8x384xbf16>
    %48 = vector.shape_cast %47 : vector<1x8x384xbf16> to vector<8x384xbf16>
    %c8 = arith.constant 8 : index
    %c0_44 = arith.constant 0 : index
    %c0_45 = arith.constant 0 : index
    %49 = vector.load %arg1[%c8, %c0_44, %c0_45] : memref<9x8x8xbf16, #tpu.memory_space<vmem>>, vector<1x8x8xbf16>
    %50 = vector.shape_cast %49 : vector<1x8x8xbf16> to vector<8x8xbf16>
    %cst_46 = arith.constant dense<0.000000e+00> : vector<8x384xf32>
    %51 = tpu.matmul %50, %48, %cst_46 {dimension_numbers = #tpu.dot_dimension_numbers<[1], [0], [0], [1], [0, 0, 1, 1], [], []>} : vector<8x8xbf16>, vector<8x384xbf16>, vector<8x384xf32> -> vector<8x384xf32>
    %52 = arith.addf %46, %51 : vector<8x384xf32>
    %c0_47 = arith.constant 0 : index
    %c0_48 = arith.constant 0 : index
    %53 = vector.load %arg2[%c0_47, %c0_48] : memref<8x1xf32, #tpu.memory_space<vmem>>, vector<8x1xf32>
    %54 = vector.broadcast %53 : vector<8x1xf32> to vector<8x384xf32>
    %55 = arith.addf %52, %54 : vector<8x384xf32>
    %c0_49 = arith.constant 0 : index
    %c0_50 = arith.constant 0 : index
    %c0_51 = arith.constant 0 : index
    %c0_52 = arith.constant 0 : index
    %56 = vector.load %arg4[%c0_49, %c0_50, %c0_51, %c0_52] : memref<1x1x8x384xf32, #tpu.memory_space<vmem>>, vector<1x1x8x384xf32>
    %57 = vector.shape_cast %56 : vector<1x1x8x384xf32> to vector<8x384xf32>
    %58 = vector.shape_cast %55 : vector<8x384xf32> to vector<1x1x8x384xf32>
    tpu.vector_store %arg4[%c0_49, %c0_50, %c0_51, %c0_52], %58 {strides = array<i32>} : memref<1x1x8x384xf32, #tpu.memory_space<vmem>>, vector<1x1x8x384xf32>,
    return
  }
  func.func @transform_0(%arg0: i32) -> (i32, i32, i32) {
    %c0_i32 = arith.constant 0 : i32
    %c0_i32_0 = arith.constant 0 : i32
    %c0_i32_1 = arith.constant 0 : i32
    %c0_i32_2 = arith.constant 0 : i32
    return %c0_i32, %c0_i32_0, %c0_i32_1 : i32, i32, i32
  }
  func.func @transform_1(%arg0: i32) -> (i32, i32) {
    %c0_i32 = arith.constant 0 : i32
    %c0_i32_0 = arith.constant 0 : i32
    %c0_i32_1 = arith.constant 0 : i32
    return %c0_i32, %c0_i32_0 : i32, i32
  }
  func.func @transform_2(%arg0: i32) -> (i32, i32, i32) {
    %c0_i32 = arith.constant 0 : i32
    %c0_i32_0 = arith.constant 0 : i32
    %c0_i32_1 = arith.constant 0 : i32
    return %arg0, %c0_i32, %c0_i32_0 : i32, i32, i32
  }
  func.func @transform_3(%arg0: i32) -> (i32, i32, i32, i32) {
    %c0_i32 = arith.constant 0 : i32
    %c0_i32_0 = arith.constant 0 : i32
    %c0_i32_1 = arith.constant 0 : i32
    %c0_i32_2 = arith.constant 0 : i32
    return %arg0, %c0_i32, %c0_i32_0, %c0_i32_1 : i32, i32, i32, i32
  }
}

</mosaic_0001>

<bundles_post_ra>
// kernel: _lambda_.1
= control target key start
LH: loop header
LB: loop body
LE: loop exit
PB: predicated region body
PF: predicated region fallthrough
CT: control target
= control target key end

     0   :  { %s1424_s12 = smov 0   ;;  %s1573_s0 = inlined_call_operand.vmem [shape: bf16[9,8,8], index: 0, kind: input, shape index: {}]   ;;  %s1574_s1 = inlined_call_operand.vmem [shape: f32[8,1], index: 1, kind: input, shape index: {}]   ;;  %s1575_s2 = inlined_call_operand.vmem [shape: bf16[2,8,512], index: 2, kind: input, shape index: {}]   ;;  %s1576_s3 = inlined_call_operand.vmem [shape: f32[2,1,8,384], index: 3, kind: output, shape index: {}]  }
   0x1 LB: > { %s1234_s13 = sadd.s32 4294967295, %s1391_s12   ;;  %p1238_p0 = scmp.ge.s32.totalorder %s1391_s12, 1  ;;  %s1391_s12 = sphi %s1424_s12, %s13_s12  }
   0x2   : > { %p137_p1 = scmp.lt.s32.totalorder %s1391_s12, 3 }
   0x4   : > { %p138_p2 = pnand %p1238_p0, %p137_p1 }
   0x5   : > { %p161_p3 = scmp.lt.s32.totalorder (!%p138_p2), %s1234_s13, 1  ;;  %s1396_s18 = smov (!%p138_p2), 127  }
   0x6   : > { %141 = sbr.rel (%p138_p2) target bundleno = 405 (0x195), region = 32  ;;  %s1397_s19 = smov (!%p138_p2), 126  }
   0x7   : > { %s1398_s20 = smov (!%p138_p2), 110   ;;  %s1399_s21 = smov (!%p138_p2), 109  }
   0x8   : > { %s1400_s22 = smov (!%p138_p2), 108   ;;  %s1401_s23 = smov (!%p138_p2), 92  }
   0x9   : > { %s1402_s24 = smov (!%p138_p2), 91   ;;  %s1403_s25 = smov (!%p138_p2), 90  }
   0xb   : > { %v1393_v0 = vmov 0.0   ;;  %s1578_s13 = smov (!%p161_p3, %s1234_s13), 1  ;;  %v1394_v1 = vmov 0   ;;  %vm1395_vm0 = vmmov 0   ;;  %v1167_v8 = vld [vmem:[%s1574_s1] sm:$0xff]  ;;  %vm197_vm1 = vcmask 1039360  }
   0xc   : > { %1305 = vmatprep.subr.bf16.mxu1 %v1393_v0  ;;  %247 = vmatprep.mubr.bf16.mxu0 %v1394_v1  ;;  %s1286_s14 = sshll.u32 %s1578_s13, 4  ;;  %vm205_vm2 = vcmask 1043456   ;;  %v1242_v19 = vld [vmem:[%s1573_s0 + $0x4] sm:$0xf]  ;;  %vm201_vm3 = vcmask 64512   ;;  %vm407_vm4 = vcmask 1031168  }
   0xd   : > { %1307 = vmatprep.mubr.msk.bf16.mxu1 %vm1395_vm0, %v1393_v0  ;;  %1379 = vset.pattern.permute.xlu0 %v1394_v1  ;;  %s1443_s17 = scalar_lea.vmem %s1575_s2, %s1286_s14  ;;  %v174_v29 = vld [vmem:[%s1573_s0] sm:$0xf]  ;;  %vm517_vm5 = vcmask 900096   ;;  %v1256_v39 = vld [vmem:[%s1573_s0 + $0x8] sm:$0xf]  ;;  %vm627_vm6 = vcmask 891904  }
   0xe   : > { %v176_v2 = vld [vmem:[%s1443_s17 + $0x8] sm:$0xff]  ;;  %v175_v3 = vld [vmem:[%s1443_s17] sm:$0xff]  ;;  %vm737_vm7 = vcmask 883712   ;;  %v1264_v59 = vld [vmem:[%s1573_s0 + $0x10] sm:$0xf]  ;;  %vm847_vm8 = vcmask 752640  }
   0xf   : > { %v1245_v4 = vcombine.low %v176_v2, %v176_v2  ;;  %v1447_v5 = vcombine.low %v175_v3, %v175_v3  ;;  %v1246_v6 = vcombine.high %v176_v2, %v176_v2  ;;  %v1244_v7 = vcombine.high %v175_v3, %v175_v3  ;;  %v1384_v13 = vld [vmem:[%s1443_s17 + $0x8] ss:$0 sps:$4 sm:$0xff]   ;;  %v1260_v49 = vld [vmem:[%s1573_s0 + $0xc] sm:$0xf] }
  0x10   : > { %v314_v23 = vsel %vm205_vm2, %v1384_v13, 0  ;;  %vm957_vm9 = vcmask 744448   ;;  %vm1067_vm10 = vcmask 736256  }
  0x11   : > { %193 = vrot.lane.b32.xlu1 %v1245_v4, %s1396_s18  ;;  %189 = vrot.lane.b32.xlu0 %v1447_v5, %s1396_s18  ;;  %v308_v21 = vsel %vm205_vm2, %v1447_v5, 0 }
  0x15   : > { %195 = vrot.lane.b32.xlu1 %v1246_v6, %s1396_s18  ;;  %191 = vrot.lane.b32.xlu0 %v1244_v7, %s1396_s18 }
  0x19   : > { %399 = vrot.lane.b32.xlu0 %v1447_v5, %s1397_s19  ;;  %401 = vrot.lane.b32.xlu1 %v1244_v7, %s1397_s19 }
  0x1d   : > { %403 = vrot.lane.b32.xlu0 %v1245_v4, %s1397_s19  ;;  %405 = vrot.lane.b32.xlu1 %v1246_v6, %s1397_s19 }
  0x21   : > { %509 = vrot.lane.b32.xlu0 %v1447_v5, %s1398_s20  ;;  %511 = vrot.lane.b32.xlu1 %v1244_v7, %s1398_s20 }
  0x25   : > { %513 = vrot.lane.b32.xlu0 %v1245_v4, %s1398_s20  ;;  %515 = vrot.lane.b32.xlu1 %v1246_v6, %s1398_s20 }
  0x29   : > { %619 = vrot.lane.b32.xlu0 %v1447_v5, %s1399_s21  ;;  %621 = vrot.lane.b32.xlu1 %v1244_v7, %s1399_s21 }
  0x2d   : > { %623 = vrot.lane.b32.xlu0 %v1245_v4, %s1399_s21  ;;  %625 = vrot.lane.b32.xlu1 %v1246_v6, %s1399_s21  ;;  %s1359_s21 = smul.u32 24, %s1578_s13 }
  0x31   : > { %729 = vrot.lane.b32.xlu0 %v1447_v5, %s1400_s22  ;;  %731 = vrot.lane.b32.xlu1 %v1244_v7, %s1400_s22 }
  0x35   : > { %733 = vrot.lane.b32.xlu0 %v1245_v4, %s1400_s22  ;;  %735 = vrot.lane.b32.xlu1 %v1246_v6, %s1400_s22 }
  0x39   : > { %839 = vrot.lane.b32.xlu0 %v1447_v5, %s1401_s23  ;;  %841 = vrot.lane.b32.xlu1 %v1244_v7, %s1401_s23 }
  0x3d   : > { %843 = vrot.lane.b32.xlu0 %v1245_v4, %s1401_s23  ;;  %845 = vrot.lane.b32.xlu1 %v1246_v6, %s1401_s23 }
  0x41   : > { %949 = vrot.lane.b32.xlu0 %v1447_v5, %s1402_s24  ;;  %951 = vrot.lane.b32.xlu1 %v1244_v7, %s1402_s24 }
  0x45   : > { %953 = vrot.lane.b32.xlu0 %v1245_v4, %s1402_s24  ;;  %955 = vrot.lane.b32.xlu1 %v1246_v6, %s1402_s24  ;;  %s170_s24 = scalar_lea.vmem %s1576_s3, %s1359_s21 }
  0x49   : > { %1059 = vrot.lane.b32.xlu0 %v1447_v5, %s1403_s25  ;;  %1061 = vrot.lane.b32.xlu1 %v1244_v7, %s1403_s25 }
  0x4d   : > { %1063 = vrot.lane.b32.xlu0 %v1245_v4, %s1403_s25  ;;  %1065 = vrot.lane.b32.xlu1 %v1246_v6, %s1403_s25 }
  0x51   : > { %1170 = vperm.xlu0 %1379, %v1167_v8  }
  0x83   : > { %v194_v9 = vpop.permute.xlu1 %193  ;;  %v190_v10 = vpop.permute.xlu0 %189 }
  0x87   : > { %v196_v11 = vpop.permute.xlu1 %195  ;;  %v192_v12 = vpop.permute.xlu0 %191 }
  0x88   : > { %v199_v14 = vsel %vm197_vm1, %v192_v12, %v194_v9  ;;  %v198_v15 = vsel %vm197_vm1, %v190_v10, %v192_v12  ;;  %v200_v16 = vsel %vm197_vm1, %v194_v9, %v196_v11 }
  0x89   : > { %1247 = vmatprep.subr.msk.bf16.mxu0 %vm205_vm2, %v199_v14  ;;  %v207_v17 = vsel %vm205_vm2, %v198_v15, 0  ;;  %v213_v18 = vsel %vm205_vm2, %v200_v16, 0 }
  0x8a   : > { %230 = vmatpush1.bf16.msra.mxu0 %v207_v17  ;;  %1306 = vmatpush3.bf16.msra.mxu1 %v213_v18  ;;  %v1272_v17 = vld [vmem:[%s1573_s0 + $0x18] sm:$0xf] }
  0x8b   : > { %v400_v20 = vpop.permute.xlu0 %399  ;;  %1253 = vmatprep.subr.msk.bf16.mxu0 %vm205_vm2, %v1244_v7  ;;  %1311 = vmatprep.subr.bf16.mxu1 %v1393_v0  ;;  %v402_v22 = vpop.permute.xlu1 %401  ;;  %v1268_v7 = vld [vmem:[%s1573_s0 + $0x14] sm:$0xf] }
  0x8c   : > { %v408_v26 = vsel %vm407_vm4, %v400_v20, %v402_v22 }
  0x8d   : > { %1248 = vmatmul.mubr.msk.bf16.vlgmr.msra.gmra.mxu0 %vm201_vm3, %v1242_v19  ;;  %1308 = vmatmul.mubr.msk.bf16.vlgmr.msra.gmra.mxu1 %vm201_vm3, %v1242_v19  ;;  %v415_v30 = vsel %vm205_vm2, %v408_v26, 0 }
  0x8e   : > { %331 = vmatpush1.bf16.msra.mxu0 %v308_v21  ;;  %1312 = vmatpush3.bf16.msra.mxu1 %v314_v23 }
  0x8f   : > { %v404_v24 = vpop.permute.xlu0 %403  ;;  %v406_v25 = vpop.permute.xlu1 %405  ;;  %348 = vmatprep.mubr.bf16.mxu0 %v1394_v1  ;;  %1313 = vmatprep.mubr.msk.bf16.mxu1 %vm1395_vm0, %v1393_v0 }
  0x90   : > { %v409_v27 = vsel %vm407_vm4, %v402_v22, %v404_v24  ;;  %v410_v28 = vsel %vm407_vm4, %v404_v24, %v406_v25  ;;  %1317 = vmatprep.subr.bf16.mxu1 %v1393_v0 }
  0x91   : > { %1257 = vmatprep.subr.msk.bf16.mxu0 %vm205_vm2, %v409_v27  ;;  %v421_v31 = vsel %vm205_vm2, %v410_v28, 0  ;;  %v1276_v27 = vld [vmem:[%s1573_s0 + $0x1c] sm:$0xf] }
  0x93   : > { %v510_v32 = vpop.permute.xlu0 %509  ;;  %v512_v33 = vpop.permute.xlu1 %511 }
  0x94   : > { %v518_v36 = vsel %vm517_vm5, %v510_v32, %v512_v33 }
  0x95   : > { %1254 = vmatmul.mubr.msk.bf16.vlgmr.msra.gmra.mxu0 %vm201_vm3, %v174_v29  ;;  %1314 = vmatmul.mubr.msk.bf16.vlgmr.msra.gmra.mxu1 %vm201_vm3, %v174_v29  ;;  %v525_v40 = vsel %vm205_vm2, %v518_v36, 0 }
  0x96   : > { %438 = vmatpush1.bf16.msra.mxu0 %v415_v30  ;;  %1318 = vmatpush3.bf16.msra.mxu1 %v421_v31  ;;  %v1280_v30 = vld [vmem:[%s1573_s0 + $0x20] sm:$0xf] }
  0x97   : > { %v514_v34 = vpop.permute.xlu0 %513  ;;  %v516_v35 = vpop.permute.xlu1 %515  ;;  %455 = vmatprep.mubr.bf16.mxu0 %v1394_v1  ;;  %1319 = vmatprep.mubr.msk.bf16.mxu1 %vm1395_vm0, %v1393_v0 }
  0x98   : > { %v519_v37 = vsel %vm517_vm5, %v512_v33, %v514_v34  ;;  %v520_v38 = vsel %vm517_vm5, %v514_v34, %v516_v35  ;;  %1323 = vmatprep.subr.bf16.mxu1 %v1393_v0 }
  0x99   : > { %1261 = vmatprep.subr.msk.bf16.mxu0 %vm205_vm2, %v519_v37  ;;  %v531_v41 = vsel %vm205_vm2, %v520_v38, 0 }
  0x9b   : > { %v620_v42 = vpop.permute.xlu0 %619  ;;  %v622_v43 = vpop.permute.xlu1 %621 }
  0x9c   : > { %v628_v46 = vsel %vm627_vm6, %v620_v42, %v622_v43 }
  0x9d   : > { %1258 = vmatmul.mubr.msk.bf16.vlgmr.msra.gmra.mxu0 %vm201_vm3, %v1256_v39  ;;  %1320 = vmatmul.mubr.msk.bf16.vlgmr.msra.gmra.mxu1 %vm201_vm3, %v1256_v39  ;;  %v635_v50 = vsel %vm205_vm2, %v628_v46, 0 }
  0x9e   : > { %548 = vmatpush1.bf16.msra.mxu0 %v525_v40  ;;  %1324 = vmatpush3.bf16.msra.mxu1 %v531_v41 }
  0x9f   : > { %v624_v44 = vpop.permute.xlu0 %623  ;;  %v626_v45 = vpop.permute.xlu1 %625  ;;  %565 = vmatprep.mubr.bf16.mxu0 %v1394_v1  ;;  %1325 = vmatprep.mubr.msk.bf16.mxu1 %vm1395_vm0, %v1393_v0 }
  0xa0   : > { %v629_v47 = vsel %vm627_vm6, %v622_v43, %v624_v44  ;;  %v630_v48 = vsel %vm627_vm6, %v624_v44, %v626_v45  ;;  %1329 = vmatprep.subr.bf16.mxu1 %v1393_v0 }
  0xa1   : > { %1265 = vmatprep.subr.msk.bf16.mxu0 %vm205_vm2, %v629_v47  ;;  %v641_v51 = vsel %vm205_vm2, %v630_v48, 0 }
  0xa3   : > { %v730_v52 = vpop.permute.xlu0 %729  ;;  %v732_v53 = vpop.permute.xlu1 %731 }
  0xa4   : > { %v738_v56 = vsel %vm737_vm7, %v730_v52, %v732_v53 }
  0xa5   : > { %1262 = vmatmul.mubr.msk.bf16.vlgmr.msra.gmra.mxu0 %vm201_vm3, %v1260_v49  ;;  %1326 = vmatmul.mubr.msk.bf16.vlgmr.msra.gmra.mxu1 %vm201_vm3, %v1260_v49  ;;  %v745_v60 = vsel %vm205_vm2, %v738_v56, 0 }
  0xa6   : > { %658 = vmatpush1.bf16.msra.mxu0 %v635_v50  ;;  %1330 = vmatpush3.bf16.msra.mxu1 %v641_v51 }
  0xa7   : > { %v734_v54 = vpop.permute.xlu0 %733  ;;  %v736_v55 = vpop.permute.xlu1 %735  ;;  %675 = vmatprep.mubr.bf16.mxu0 %v1394_v1  ;;  %1331 = vmatprep.mubr.msk.bf16.mxu1 %vm1395_vm0, %v1393_v0 }
  0xa8   : > { %v739_v57 = vsel %vm737_vm7, %v732_v53, %v734_v54  ;;  %v740_v58 = vsel %vm737_vm7, %v734_v54, %v736_v55  ;;  %1335 = vmatprep.subr.bf16.mxu1 %v1393_v0 }
  0xa9   : > { %1269 = vmatprep.subr.msk.bf16.mxu0 %vm205_vm2, %v739_v57  ;;  %v751_v61 = vsel %vm205_vm2, %v740_v58, 0 }
  0xab   : > { %v840_v62 = vpop.permute.xlu0 %839  ;;  %v842_v63 = vpop.permute.xlu1 %841 }
  0xac   : > { %v848_v4 = vsel %vm847_vm8, %v840_v62, %v842_v63 }
  0xad   : > { %1266 = vmatmul.mubr.msk.bf16.vlgmr.msra.gmra.mxu0 %vm201_vm3, %v1264_v59  ;;  %1332 = vmatmul.mubr.msk.bf16.vlgmr.msra.gmra.mxu1 %vm201_vm3, %v1264_v59  ;;  %v855_v8 = vsel %vm205_vm2, %v848_v4, 0 }
  0xae   : > { %768 = vmatpush1.bf16.msra.mxu0 %v745_v60  ;;  %1336 = vmatpush3.bf16.msra.mxu1 %v751_v61 }
  0xaf   : > { %v844_v2 = vpop.permute.xlu0 %843  ;;  %v846_v3 = vpop.permute.xlu1 %845  ;;  %785 = vmatprep.mubr.bf16.mxu0 %v1394_v1  ;;  %1337 = vmatprep.mubr.msk.bf16.mxu1 %vm1395_vm0, %v1393_v0 }
  0xb0   : > { %v849_v5 = vsel %vm847_vm8, %v842_v63, %v844_v2  ;;  %v850_v6 = vsel %vm847_vm8, %v844_v2, %v846_v3  ;;  %1341 = vmatprep.subr.bf16.mxu1 %v1393_v0 }
  0xb1   : > { %1273 = vmatprep.subr.msk.bf16.mxu0 %vm205_vm2, %v849_v5  ;;  %v861_v9 = vsel %vm205_vm2, %v850_v6, 0 }
  0xb3   : > { %v950_v10 = vpop.permute.xlu0 %949  ;;  %v952_v11 = vpop.permute.xlu1 %951 }
  0xb4   : > { %v958_v14 = vsel %vm957_vm9, %v950_v10, %v952_v11 }
  0xb5   : > { %1270 = vmatmul.mubr.msk.bf16.vlgmr.msra.gmra.mxu0 %vm201_vm3, %v1268_v7  ;;  %1338 = vmatmul.mubr.msk.bf16.vlgmr.msra.gmra.mxu1 %vm201_vm3, %v1268_v7  ;;  %v965_v18 = vsel %vm205_vm2, %v958_v14, 0 }
  0xb6   : > { %878 = vmatpush1.bf16.msra.mxu0 %v855_v8  ;;  %1342 = vmatpush3.bf16.msra.mxu1 %v861_v9 }
  0xb7   : > { %v954_v12 = vpop.permute.xlu0 %953  ;;  %v956_v13 = vpop.permute.xlu1 %955  ;;  %895 = vmatprep.mubr.bf16.mxu0 %v1394_v1  ;;  %1343 = vmatprep.mubr.msk.bf16.mxu1 %vm1395_vm0, %v1393_v0 }
  0xb8   : > { %v959_v15 = vsel %vm957_vm9, %v952_v11, %v954_v12  ;;  %v960_v16 = vsel %vm957_vm9, %v954_v12, %v956_v13  ;;  %1347 = vmatprep.subr.bf16.mxu1 %v1393_v0 }
  0xb9   : > { %1277 = vmatprep.subr.msk.bf16.mxu0 %vm205_vm2, %v959_v15  ;;  %v971_v19 = vsel %vm205_vm2, %v960_v16, 0 }
  0xbb   : > { %v1060_v20 = vpop.permute.xlu0 %1059  ;;  %v1062_v21 = vpop.permute.xlu1 %1061 }
  0xbc   : > { %v1068_v24 = vsel %vm1067_vm10, %v1060_v20, %v1062_v21 }
  0xbd   : > { %1274 = vmatmul.mubr.msk.bf16.vlgmr.msra.gmra.mxu0 %vm201_vm3, %v1272_v17  ;;  %1344 = vmatmul.mubr.msk.bf16.vlgmr.msra.gmra.mxu1 %vm201_vm3, %v1272_v17  ;;  %v1075_v28 = vsel %vm205_vm2, %v1068_v24, 0 }
  0xbe   : > { %988 = vmatpush1.bf16.msra.mxu0 %v965_v18  ;;  %1348 = vmatpush3.bf16.msra.mxu1 %v971_v19 }
  0xbf   : > { %v1064_v22 = vpop.permute.xlu0 %1063  ;;  %v1066_v23 = vpop.permute.xlu1 %1065  ;;  %1005 = vmatprep.mubr.bf16.mxu0 %v1394_v1  ;;  %1349 = vmatprep.mubr.msk.bf16.mxu1 %vm1395_vm0, %v1393_v0 }
  0xc0   : > { %v1069_v25 = vsel %vm1067_vm10, %v1062_v21, %v1064_v22  ;;  %v1070_v26 = vsel %vm1067_vm10, %v1064_v22, %v1066_v23  ;;  %1353 = vmatprep.subr.bf16.mxu1 %v1393_v0 }
  0xc1   : > { %1281 = vmatprep.subr.msk.bf16.mxu0 %vm205_vm2, %v1069_v25  ;;  %v1081_v29 = vsel %vm205_vm2, %v1070_v26, 0 }
  0xc5   : > { %1278 = vmatmul.mubr.msk.bf16.vlgmr.msra.gmra.mxu0 %vm201_vm3, %v1276_v27  ;;  %1350 = vmatmul.mubr.msk.bf16.vlgmr.msra.gmra.mxu1 %vm201_vm3, %v1276_v27 }
  0xc6   : > { %1098 = vmatpush1.bf16.msra.mxu0 %v1075_v28  ;;  %1354 = vmatpush3.bf16.msra.mxu1 %v1081_v29 }
  0xc7   : > { %1115 = vmatprep.mubr.bf16.mxu0 %v1394_v1  ;;  %1355 = vmatprep.mubr.msk.bf16.mxu1 %vm1395_vm0, %v1393_v0 }
  0xcd   : > { %1282 = vmatmul.mubr.msk.bf16.vlgmr.msra.gmra.mxu0 %vm201_vm3, %v1280_v30  ;;  %1356 = vmatmul.mubr.msk.bf16.vlgmr.msra.gmra.mxu1 %vm201_vm3, %v1280_v30 }
 0x14d   : > { %v249_v31 = vpop.f32.mrf.mxu0  ;;  %v290_v32 = vpop.f32.mrf.mxu1 }
 0x14f   : > { %v251_v33 = vpop.f32.mrf.mxu0  ;;  %v1309_v34 = vpop.f32.mrf.mxu1 }
 0x151   : > { %v253_v35 = vpop.f32.mrf.mxu0  ;;  %v293_v36 = vpop.f32.mrf.mxu1 }
 0x153   : > { %v254_v37 = vpop.f32.mrf.mxu0  ;;  %v1310_v38 = vpop.f32.mrf.mxu1 }
 0x155   : > { %v350_v1 = vpop.f32.mrf.mxu0  ;;  %v391_v39 = vpop.f32.mrf.mxu1 }
 0x156   : > { %v351_v19 = vadd.f32 %v350_v1, %v249_v31  ;;  %v392_v20 = vadd.f32 %v391_v39, %v290_v32 }
 0x157   : > { %v352_v40 = vpop.f32.mrf.mxu0  ;;  %v1315_v0 = vpop.f32.mrf.mxu1 }
 0x158   : > { %v353_v23 = vadd.f32 %v352_v40, %v251_v33 }
 0x159   : > { %v354_v41 = vpop.f32.mrf.mxu0  ;;  %v394_v42 = vpop.f32.mrf.mxu1 }
 0x15b   : > { %v355_v43 = vpop.f32.mrf.mxu0  ;;  %v1316_v44 = vpop.f32.mrf.mxu1 }
 0x15d   : > { %v457_v45 = vpop.f32.mrf.mxu0  ;;  %v498_v46 = vpop.f32.mrf.mxu1 }
 0x15e   : > { %v504_v24 = vadd.f32 %v457_v45, %v351_v19  ;;  %v506_v25 = vadd.f32 %v498_v46, %v392_v20 }
 0x15f   : > { %v459_v47 = vpop.f32.mrf.mxu0  ;;  %v1321_v48 = vpop.f32.mrf.mxu1 }
 0x160   : > { %v505_v28 = vadd.f32 %v459_v47, %v353_v23 }
 0x161   : > { %v461_v49 = vpop.f32.mrf.mxu0  ;;  %v501_v50 = vpop.f32.mrf.mxu1 }
 0x162   : > { %v1171_v49 = vpop.permute.xlu0 %1170 }
 0x163   : > { %v462_v51 = vpop.f32.mrf.mxu0  ;;  %v1322_v52 = vpop.f32.mrf.mxu1 }
 0x165   : > { %v567_v53 = vpop.f32.mrf.mxu0  ;;  %v608_v54 = vpop.f32.mrf.mxu1 }
 0x166   : > { %v614_v29 = vadd.f32 %v567_v53, %v504_v24  ;;  %v616_v30 = vadd.f32 %v608_v54, %v506_v25 }
 0x167   : > { %v569_v55 = vpop.f32.mrf.mxu0  ;;  %v1327_v56 = vpop.f32.mrf.mxu1 }
 0x168   : > { %v615_v36 = vadd.f32 %v569_v55, %v505_v28 }
 0x169   : > { %v571_v57 = vpop.f32.mrf.mxu0  ;;  %v611_v58 = vpop.f32.mrf.mxu1 }
 0x16b   : > { %v572_v59 = vpop.f32.mrf.mxu0  ;;  %v1328_v60 = vpop.f32.mrf.mxu1 }
 0x16d   : > { %v677_v61 = vpop.f32.mrf.mxu0  ;;  %v718_v62 = vpop.f32.mrf.mxu1 }
 0x16e   : > { %v724_v37 = vadd.f32 %v677_v61, %v614_v29  ;;  %v726_v38 = vadd.f32 %v718_v62, %v616_v30 }
 0x16f   : > { %v679_v63 = vpop.f32.mrf.mxu0  ;;  %v1333_v2 = vpop.f32.mrf.mxu1 }
 0x170   : > { %v725_v31 = vadd.f32 %v679_v63, %v615_v36 }
 0x171   : > { %v681_v3 = vpop.f32.mrf.mxu0  ;;  %v721_v4 = vpop.f32.mrf.mxu1 }
 0x173   : > { %v682_v5 = vpop.f32.mrf.mxu0  ;;  %v1334_v6 = vpop.f32.mrf.mxu1 }
 0x175   : > { %v787_v7 = vpop.f32.mrf.mxu0  ;;  %v828_v8 = vpop.f32.mrf.mxu1 }
 0x176   : > { %v834_v32 = vadd.f32 %v787_v7, %v724_v37  ;;  %v836_v1 = vadd.f32 %v828_v8, %v726_v38 }
 0x177   : > { %v789_v9 = vpop.f32.mrf.mxu0  ;;  %v1339_v10 = vpop.f32.mrf.mxu1 }
 0x178   : > { %v835_v40 = vadd.f32 %v789_v9, %v725_v31 }
 0x179   : > { %v791_v11 = vpop.f32.mrf.mxu0  ;;  %v831_v12 = vpop.f32.mrf.mxu1 }
 0x17b   : > { %v792_v13 = vpop.f32.mrf.mxu0  ;;  %v1340_v14 = vpop.f32.mrf.mxu1 }
 0x17d   : > { %v897_v15 = vpop.f32.mrf.mxu0  ;;  %v938_v16 = vpop.f32.mrf.mxu1 }
 0x17e   : > { %v944_v42 = vadd.f32 %v897_v15, %v834_v32  ;;  %v946_v43 = vadd.f32 %v938_v16, %v836_v1 }
 0x17f   : > { %v899_v17 = vpop.f32.mrf.mxu0  ;;  %v1345_v18 = vpop.f32.mrf.mxu1 }
 0x180   : > { %v945_v46 = vadd.f32 %v899_v17, %v835_v40 }
 0x181   : > { %v901_v21 = vpop.f32.mrf.mxu0  ;;  %v941_v22 = vpop.f32.mrf.mxu1 }
 0x183   : > { %v902_v26 = vpop.f32.mrf.mxu0  ;;  %v1346_v27 = vpop.f32.mrf.mxu1 }
 0x185   : > { %v1007_v34 = vpop.f32.mrf.mxu0  ;;  %v1048_v35 = vpop.f32.mrf.mxu1 }
 0x186   : > { %v1054_v47 = vadd.f32 %v1007_v34, %v944_v42  ;;  %v1056_v48 = vadd.f32 %v1048_v35, %v946_v43 }
 0x187   : > { %v1009_v0 = vpop.f32.mrf.mxu0  ;;  %v1351_v41 = vpop.f32.mrf.mxu1 }
 0x188   : > { %v1055_v52 = vadd.f32 %v1009_v0, %v945_v46 }
 0x189   : > { %v1011_v39 = vpop.f32.mrf.mxu0  ;;  %v1051_v33 = vpop.f32.mrf.mxu1 }
 0x18b   : > { %v1012_v44 = vpop.f32.mrf.mxu0  ;;  %v1352_v45 = vpop.f32.mrf.mxu1 }
 0x18d   : > { %v1117_v50 = vpop.f32.mrf.mxu0  ;;  %v1158_v51 = vpop.f32.mrf.mxu1 }
 0x18e   : > { %v1164_v53 = vadd.f32 %v1117_v50, %v1054_v47  ;;  %v1166_v54 = vadd.f32 %v1158_v51, %v1056_v48 }
 0x18f   : > { %v1119_v55 = vpop.f32.mrf.mxu0  ;;  %v1357_v56 = vpop.f32.mrf.mxu1 }
 0x190   : > { %v1173_v57 = vadd.f32 %v1171_v49, %v1164_v53  ;;  %v1175_v58 = vadd.f32 %v1171_v49, %v1166_v54  ;;  %v1165_v59 = vadd.f32 %v1119_v55, %v1055_v52 }
 0x191   : > { %v1121_v60 = vpop.f32.mrf.mxu0  ;;  %v1161_v61 = vpop.f32.mrf.mxu1 }
 0x192   : > { %1176 = vst [vmem:[%s170_s24] sm:$0xff] %v1173_v57  ;;  %1178 = vst [vmem:[%s170_s24 + $0x10] sm:$0xff] %v1175_v58  ;;  %v1174_v62 = vadd.f32 %v1171_v49, %v1165_v59 }
 0x193   : > { %v1122_v63 = vpop.f32.mrf.mxu0  ;;  %v1358_v2 = vpop.f32.mrf.mxu1 }
 0x194   : > { %1177 = vst [vmem:[%s170_s24 + $0x8] sm:$0xff] %v1174_v62 }
 0x195 PF: > { %s13_s12 = sadd.s32 1, %s1391_s12  }
 0x196   : > { %p10_p4 = scmp.ge.s32.totalorder %s13_s12, 4  }
 0x198   :  { %12 = sbr.rel (!%p10_p4) target bundleno = 1 (0x1), region = 70 }

</bundles_post_ra>
